<compile_context>
chip_gen: v7x
topology: tpu7x:2x2x1
jax: 0.10.0
libtpu: 0.0.40
codegen_flags: <defaults>
</compile_context>

<pallas_src>
import jax
import jax.numpy as jnp
from jax import lax
from jax.experimental import pallas as pl
from jax.experimental.pallas import tpu as pltpu


# ----------------------------- Pallas kernels ------------------------------ #

def _conv_bn_hswish_kernel(p_ref, w_ref, s_ref, b_ref, o_ref):
    """out = hardswish(patches @ W * bn_scale + bn_bias); all lane-dense."""
    acc = jnp.dot(p_ref[...], w_ref[...], preferred_element_type=jnp.float32)
    y = acc * s_ref[...] + b_ref[...]
    o_ref[...] = y * jnp.clip(y + 3.0, 0.0, 6.0) * (1.0 / 6.0)


def _pool_concat_conv_kernel(slab_ref, s2b_ref, wt_ref, wb_ref, s_ref, b_ref, o_ref):
    """Fused: maxpool(2,2) over 4 shifted slabs, concat with stem_2b along channels
    (realized as a row-split matmul), 1x1 conv + folded BN + Hardswish."""
    pooled = jnp.max(slab_ref[...], axis=0)                                 # (P2, C2)
    acc = jnp.dot(s2b_ref[...], wt_ref[...], preferred_element_type=jnp.float32)
    acc = acc + jnp.dot(pooled, wb_ref[...], preferred_element_type=jnp.float32)
    y = acc * s_ref[...] + b_ref[...]
    o_ref[...] = y * jnp.clip(y + 3.0, 0.0, 6.0) * (1.0 / 6.0)


# ----------------------------- pallas_call wrappers ------------------------ #

def conv_bn_hswish(patches, w2d, scale, bias):
    """patches: (B, P, Kc); w2d: (Kc, Cout); scale/bias: (1, Cout) -> (B, P, Cout)."""
    B, P, Kc = patches.shape
    Cout = w2d.shape[1]
    return pl.pallas_call(
        _conv_bn_hswish_kernel,
        out_shape=jax.ShapeDtypeStruct((B, P, Cout), jnp.float32),
        grid=(B,),
        in_specs=[
            pl.BlockSpec((None, P, Kc), lambda b: (b, 0, 0)),
            pl.BlockSpec((Kc, Cout), lambda b: (0, 0)),
            pl.BlockSpec((1, Cout), lambda b: (0, 0)),
            pl.BlockSpec((1, Cout), lambda b: (0, 0)),
        ],
        out_specs=pl.BlockSpec((None, P, Cout), lambda b: (b, 0, 0)),
        compiler_params=pltpu.CompilerParams(dimension_semantics=("parallel",)),
    )(patches, w2d, scale, bias)


def pool_concat_conv(slabs, s2b, w_top, w_bot, scale, bias):
    """slabs: (B, 4, P2, C2); s2b: (B, P2, C2); w_top/w_bot: (C2, Cout)."""
    B, nslab, P2, C2 = slabs.shape
    Cout = w_top.shape[1]
    return pl.pallas_call(
        _pool_concat_conv_kernel,
        out_shape=jax.ShapeDtypeStruct((B, P2, Cout), jnp.float32),
        grid=(B,),
        in_specs=[
            pl.BlockSpec((None, nslab, P2, C2), lambda b: (b, 0, 0, 0)),
            pl.BlockSpec((None, P2, C2), lambda b: (b, 0, 0)),
            pl.BlockSpec((C2, Cout), lambda b: (0, 0)),
            pl.BlockSpec((C2, Cout), lambda b: (0, 0)),
            pl.BlockSpec((1, Cout), lambda b: (0, 0)),
            pl.BlockSpec((1, Cout), lambda b: (0, 0)),
        ],
        out_specs=pl.BlockSpec((None, P2, Cout), lambda b: (b, 0, 0)),
        compiler_params=pltpu.CompilerParams(dimension_semantics=("parallel",)),
    )(slabs, s2b, w_top, w_bot, scale, bias)


# ----------------------------- layout plumbing (wrapper) ------------------- #

def _im2col(x, k, s, p):
    """x: (B, H, W, C) NHWC -> patches (B, Ho*Wo, k*k*C), ordering (ki, kj, c)."""
    B, H, W, C = x.shape
    xp = jnp.pad(x, ((0, 0), (p, p), (p, p), (0, 0)))
    Ho = (H + 2 * p - k) // s + 1
    Wo = (W + 2 * p - k) // s + 1
    cols = []
    for ki in range(k):
        for kj in range(k):
            cols.append(xp[:, ki:ki + s * Ho:s, kj:kj + s * Wo:s, :])
    patches = jnp.concatenate(cols, axis=-1)
    return patches.reshape(B, Ho * Wo, k * k * C), Ho, Wo


def _pool_slabs(x):
    """MaxPool2d(k=2, s=2, ceil_mode=True) pre-slabs: (B,H,W,C) -> (B, 4, Ho*Wo, C)."""
    B, H, W, C = x.shape
    Ho, Wo = -(-H // 2), -(-W // 2)
    ph, pw = 2 * Ho - H, 2 * Wo - W
    xp = jnp.pad(x, ((0, 0), (0, ph), (0, pw), (0, 0)),
                 constant_values=-jnp.inf)            # ceil_mode padding (ignored rows)
    slabs = [xp[:, di::2, dj::2, :].reshape(B, Ho * Wo, C)
             for di in (0, 1) for dj in (0, 1)]
    return jnp.stack(slabs, axis=1)


def stem_block_forward(x_nchw, params):
    x = jnp.transpose(x_nchw, (0, 2, 3, 1)).astype(jnp.float32)            # NHWC
    B = x.shape[0]
    c2 = params["w1"].shape[-1]

    # stem_1: 3x3 stride-2 Conv+BN+Hardswish
    p1, ho1, wo1 = _im2col(x, 3, 2, 1)
    s1 = conv_bn_hswish(p1, params["w1"].reshape(-1, c2),
                        params["sc1"], params["bi1"])                       # (B, ho1*wo1, c2)

    # stem_2a: 1x1 Conv+BN+Hardswish
    s2a = conv_bn_hswish(s1, params["w2a"].reshape(c2, c2 // 2),
                         params["sc2a"], params["bi2a"])                    # (B, ho1*wo1, c2//2)

    # stem_2b: 3x3 stride-2 Conv+BN+Hardswish
    p2b, ho2, wo2 = _im2col(s2a.reshape(B, ho1, wo1, c2 // 2), 3, 2, 1)
    s2b = conv_bn_hswish(p2b, params["w2b"].reshape(-1, c2),
                         params["sc2b"], params["bi2b"])                    # (B, ho2*wo2, c2)

    # stem_2p (maxpool) + concat + stem_3 (1x1 Conv+BN+Hardswish), fully fused
    slabs = _pool_slabs(s1.reshape(B, ho1, wo1, c2))                        # (B, 4, ho2*wo2, c2)
    w3 = params["w3"].reshape(2 * c2, c2)
    out = pool_concat_conv(slabs, s2b, w3[:c2], w3[c2:],
                           params["sc3"], params["bi3"])                    # (B, ho2*wo2, c2)
    return jnp.transpose(out.reshape(B, ho2, wo2, c2), (0, 3, 1, 2))        # NCHW


# ----------------------------- pure-JAX reference -------------------------- #

def _ref_conv(x, w_hwio, scale, bias, stride, pad):
    y = lax.conv_general_dilated(
        x, w_hwio, (stride, stride), ((pad, pad), (pad, pad)),
        dimension_numbers=("NHWC", "HWIO", "NHWC"),
        precision=lax.Precision.HIGHEST)
    y = y * scale.reshape(1, 1, 1, -1) + bias.reshape(1, 1, 1, -1)
    return y * jnp.clip(y + 3.0, 0.0, 6.0) * (1.0 / 6.0)


def stem_block_ref(x_nchw, params):
    x = jnp.transpose(x_nchw, (0, 2, 3, 1)).astype(jnp.float32)
    s1 = _ref_conv(x, params["w1"], params["sc1"], params["bi1"], 2, 1)
    s2a = _ref_conv(s1, params["w2a"], params["sc2a"], params["bi2a"], 1, 0)
    s2b = _ref_conv(s2a, params["w2b"], params["sc2b"], params["bi2b"], 2, 1)
    s2p = lax.reduce_window(s1, -jnp.inf, lax.max,
                            (1, 2, 2, 1), (1, 2, 2, 1),
                            ((0, 0), (0, 0), (0, 0), (0, 0)))
    out = _ref_conv(jnp.concatenate([s2b, s2p], axis=-1),
                    params["w3"], params["sc3"], params["bi3"], 1, 0)
    return jnp.transpose(out, (0, 3, 1, 2))


# ----------------------------- parameter construction ---------------------- #

def make_params(key, c1, c2, eps=1e-5):
    ks = jax.random.split(key, 8)

    def conv_w(k, kk, cin, cout):
        return jax.random.normal(k, (kk, kk, cin, cout), jnp.float32) / jnp.sqrt(kk * kk * cin)

    def bn(k, c):
        k1, k2, k3, k4 = jax.random.split(k, 4)
        gamma = jax.random.uniform(k1, (c,), jnp.float32, 0.5, 1.5)
        beta = 0.1 * jax.random.normal(k2, (c,), jnp.float32)
        mean = 0.1 * jax.random.normal(k3, (c,), jnp.float32)
        var = jax.random.uniform(k4, (c,), jnp.float32, 0.5, 1.5)
        scale = gamma * lax.rsqrt(var + eps)            # eval-mode BN folded into scale/bias
        bias = beta - mean * scale
        return scale.reshape(1, c), bias.reshape(1, c)

    p = {}
    p["w1"] = conv_w(ks[0], 3, c1, c2);        p["sc1"], p["bi1"] = bn(ks[1], c2)
    p["w2a"] = conv_w(ks[2], 1, c2, c2 // 2);  p["sc2a"], p["bi2a"] = bn(ks[3], c2 // 2)
    p["w2b"] = conv_w(ks[4], 3, c2 // 2, c2);  p["sc2b"], p["bi2b"] = bn(ks[5], c2)
    p["w3"] = conv_w(ks[6], 1, 2 * c2, c2);    p["sc3"], p["bi3"] = bn(ks[7], c2)
    return p


# ----------------------------- main ---------------------------------------- #

if __name__ == "__main__":
    key = jax.random.PRNGKey(0)
    kx, kp = jax.random.split(key)
    B, C1, HW, C2 = 2, 4, 16, 32

    x = jax.random.uniform(kx, (B, C1, HW, HW), jnp.float32, -1.0, 1.0)
    params = make_params(kp, C1, C2)

    out = jax.block_until_ready(stem_block_forward(x, params))
    ref = jax.block_until_ready(stem_block_ref(x, params))

    assert out.shape == (B, C2, HW // 4, HW // 4), out.shape
    assert bool(jnp.all(jnp.isfinite(out)))
    err = float(jnp.max(jnp.abs(out - ref)))
    assert err < 5e-2, f"max abs err vs reference = {err}"
    print("KERNEL_OK")
</pallas_src>

<mosaic_0001>
module attributes {stable_mosaic.version = 11 : i64} {
  func.func @_conv_bn_hswish_kernel(%arg0: i32, %arg1: memref<1x64x36xf32, #tpu.memory_space<vmem>>, %arg2: memref<36x32xf32, #tpu.memory_space<vmem>>, %arg3: memref<1x32xf32, #tpu.memory_space<vmem>>, %arg4: memref<1x32xf32, #tpu.memory_space<vmem>>, %arg5: memref<1x64x32xf32, #tpu.memory_space<vmem>>) attributes {dimension_semantics = [#tpu.dimension_semantics<parallel>], iteration_bounds = array<i64: 2>, scalar_prefetch = 0 : i64, scratch_operands = 0 : i64, tpu.core_type = #tpu.core_type<tc>, window_params = [{transform_indices = @transform_0, window_bounds = array<i64: 1, 64, 36>}, {pipeline_mode = #tpu.pipeline_mode<synchronous>, transform_indices = @transform_1, window_bounds = array<i64: 36, 32>}, {pipeline_mode = #tpu.pipeline_mode<synchronous>, transform_indices = @transform_2, window_bounds = array<i64: 1, 32>}, {pipeline_mode = #tpu.pipeline_mode<synchronous>, transform_indices = @transform_3, window_bounds = array<i64: 1, 32>}, {transform_indices = @transform_4, window_bounds = array<i64: 1, 64, 32>}]} {
    %c0 = arith.constant 0 : index
    %c0_0 = arith.constant 0 : index
    %c0_1 = arith.constant 0 : index
    %0 = vector.load %arg1[%c0, %c0_0, %c0_1] : memref<1x64x36xf32, #tpu.memory_space<vmem>>, vector<1x64x36xf32>
    %1 = vector.shape_cast %0 : vector<1x64x36xf32> to vector<64x36xf32>
    %c0_2 = arith.constant 0 : index
    %c0_3 = arith.constant 0 : index
    %2 = vector.load %arg2[%c0_2, %c0_3] : memref<36x32xf32, #tpu.memory_space<vmem>>, vector<36x32xf32>
    %cst = arith.constant dense<0.000000e+00> : vector<64x32xf32>
    %3 = tpu.matmul %1, %2, %cst {dimension_numbers = #tpu.dot_dimension_numbers<[1], [0], [0], [1], [0, 0, 1, 1], [], []>} : vector<64x36xf32>, vector<36x32xf32>, vector<64x32xf32> -> vector<64x32xf32>
    %c0_4 = arith.constant 0 : index
    %c0_5 = arith.constant 0 : index
    %4 = vector.load %arg3[%c0_4, %c0_5] : memref<1x32xf32, #tpu.memory_space<vmem>>, vector<1x32xf32>
    %5 = vector.broadcast %4 : vector<1x32xf32> to vector<64x32xf32>
    %6 = arith.mulf %3, %5 : vector<64x32xf32>
    %c0_6 = arith.constant 0 : index
    %c0_7 = arith.constant 0 : index
    %7 = vector.load %arg4[%c0_6, %c0_7] : memref<1x32xf32, #tpu.memory_space<vmem>>, vector<1x32xf32>
    %8 = vector.broadcast %7 : vector<1x32xf32> to vector<64x32xf32>
    %9 = arith.addf %6, %8 : vector<64x32xf32>
    %cst_8 = arith.constant 3.000000e+00 : f32
    %10 = vector.broadcast %cst_8 : f32 to vector<64x32xf32>
    %11 = arith.addf %9, %10 : vector<64x32xf32>
    %cst_9 = arith.constant 0.000000e+00 : f32
    %cst_10 = arith.constant 6.000000e+00 : f32
    %12 = vector.broadcast %cst_9 : f32 to vector<64x32xf32>
    %13 = arith.maximumf %12, %11 : vector<64x32xf32>
    %14 = vector.broadcast %cst_10 : f32 to vector<64x32xf32>
    %15 = arith.minimumf %14, %13 : vector<64x32xf32>
    %16 = arith.mulf %9, %15 : vector<64x32xf32>
    %cst_11 = arith.constant 0.166666672 : f32
    %17 = vector.broadcast %cst_11 : f32 to vector<64x32xf32>
    %18 = arith.mulf %16, %17 : vector<64x32xf32>
    %c0_12 = arith.constant 0 : index
    %c0_13 = arith.constant 0 : index
    %c0_14 = arith.constant 0 : index
    %19 = vector.load %arg5[%c0_12, %c0_13, %c0_14] : memref<1x64x32xf32, #tpu.memory_space<vmem>>, vector<1x64x32xf32>
    %20 = vector.shape_cast %19 : vector<1x64x32xf32> to vector<64x32xf32>
    %21 = vector.shape_cast %18 : vector<64x32xf32> to vector<1x64x32xf32>
    tpu.vector_store %arg5[%c0_12, %c0_13, %c0_14], %21 {strides = array<i32>} : memref<1x64x32xf32, #tpu.memory_space<vmem>>, vector<1x64x32xf32>,
    return
  }
  func.func @transform_0(%arg0: i32) -> (i32, i32, i32) {
    %c0_i32 = arith.constant 0 : i32
    %c0_i32_0 = arith.constant 0 : i32
    %c0_i32_1 = arith.constant 0 : i32
    return %arg0, %c0_i32, %c0_i32_0 : i32, i32, i32
  }
  func.func @transform_1(%arg0: i32) -> (i32, i32) {
    %c0_i32 = arith.constant 0 : i32
    %c0_i32_0 = arith.constant 0 : i32
    %c0_i32_1 = arith.constant 0 : i32
    return %c0_i32, %c0_i32_0 : i32, i32
  }
  func.func @transform_2(%arg0: i32) -> (i32, i32) {
    %c0_i32 = arith.constant 0 : i32
    %c0_i32_0 = arith.constant 0 : i32
    %c0_i32_1 = arith.constant 0 : i32
    return %c0_i32, %c0_i32_0 : i32, i32
  }
  func.func @transform_3(%arg0: i32) -> (i32, i32) {
    %c0_i32 = arith.constant 0 : i32
    %c0_i32_0 = arith.constant 0 : i32
    %c0_i32_1 = arith.constant 0 : i32
    return %c0_i32, %c0_i32_0 : i32, i32
  }
  func.func @transform_4(%arg0: i32) -> (i32, i32, i32) {
    %c0_i32 = arith.constant 0 : i32
    %c0_i32_0 = arith.constant 0 : i32
    %c0_i32_1 = arith.constant 0 : i32
    return %arg0, %c0_i32, %c0_i32_0 : i32, i32, i32
  }
}

</mosaic_0001>

<bundles_post_ra>
// kernel: tpu_custom_call.1
= control target key start
LH: loop header
LB: loop body
LE: loop exit
PB: predicated region body
PF: predicated region fallthrough
CT: control target
= control target key end

     0   :  { %s593_s15 = smov 0   ;;  %s654_s0 = inlined_call_operand.vmem [shape: f32[2,64,36], index: 0, kind: input, shape index: {}]   ;;  %s655_s1 = inlined_call_operand.vmem [shape: f32[36,32], index: 1, kind: input, shape index: {}]   ;;  %s656_s2 = inlined_call_operand.vmem [shape: f32[1,32], index: 2, kind: input, shape index: {}]   ;;  %s657_s3 = inlined_call_operand.vmem [shape: f32[1,32], index: 3, kind: input, shape index: {}]   ;;  %s658_s4 = inlined_call_operand.vmem [shape: f32[2,64,32], index: 4, kind: output, shape index: {}]  }
   0x1 LB: > { %s479_s16 = sadd.s32 4294967295, %s566_s15   ;;  %p483_p0 = scmp.ge.s32.totalorder %s566_s15, 1  ;;  %s566_s15 = sphi %s593_s15, %s14_s15  }
   0x2   : > { %p162_p1 = scmp.lt.s32.totalorder %s566_s15, 3 }
   0x4   : > { %p163_p2 = pnand %p483_p0, %p162_p1 }
   0x5   : > { %v206_v0 = vld [vmem:[%s655_s1] sm:$0xff] (!%p163_p2)  ;;  %v207_v1 = vld [vmem:[%s655_s1 + $0x8] sm:$0xff] (!%p163_p2)  ;;  %v208_v2 = vld [vmem:[%s655_s1 + $0x10] sm:$0xff] (!%p163_p2)  ;;  %p188_p3 = scmp.lt.s32.totalorder (!%p163_p2), %s479_s16, 1  ;;  %vm211_vm0 = vcmask (!%p163_p2), 293888   ;;  %vm236_vm1 = vcmask (!%p163_p2), 1043456  }
   0x6   : > { %166 = sbr.rel (%p163_p2) target bundleno = 251 (0xfb), region = 36  ;;  %v538_v3 = vpack.c.bf16 (!%p163_p2), %v207_v1, %v206_v0  ;;  %v209_v4 = vld [vmem:[%s655_s1 + $0x18] sm:$0xff] (!%p163_p2)  ;;  %v210_v6 = vld [vmem:[%s655_s1 + $0x20] sm:$0xf] (!%p163_p2)  ;;  %vm415_vm2 = vcmask (!%p163_p2), 261120  }
   0x7   : > { %v542_v5 = vpack.c.bf16 (!%p163_p2), %v209_v4, %v208_v2  ;;  %v497_v15 = vld [vmem:[%s656_s2] ss:$0 sm:$0xff] (!%p163_p2) }
   0x8   : > { %539 = vmatprep.subr.bf16.mxu0 (!%p163_p2), %v538_v3  ;;  %546 = vmatprep.subr.bf16.mxu1 (!%p163_p2), %v538_v3  ;;  %v498_v17 = vld [vmem:[%s657_s3] ss:$0 sm:$0xff] (!%p163_p2) }
   0x9   : > { %541 = vmatpush3.bf16.msra.mxu0 (!%p163_p2), %v538_v3  ;;  %549 = vmatpush3.bf16.msra.mxu1 (!%p163_p2), %v538_v3 }
   0xa   : > { %543 = vmatprep.subr.bf16.mxu0 (!%p163_p2), %v542_v5  ;;  %547 = vmatprep.subr.bf16.mxu1 (!%p163_p2), %v542_v5 }
   0xd   : > { %s660_s16 = smov (!%p188_p3, %s479_s16), 1  ;;  %545 = vmatpush3.bf16.msra.mxu0 %v542_v5  ;;  %550 = vmatpush3.bf16.msra.mxu1 %v542_v5 }
   0xe   : > { %s501_s25 = sshll.u32 %s660_s16, 6  ;;  %524 = vmatprep.subr.msk.mxu0 %vm236_vm1, %v210_v6  ;;  %548 = vmatprep.subr.msk.mxu1 %vm236_vm1, %v210_v6 }
   0xf   : > { %s192_s28 = scalar_lea.vmem %s654_s0, %s501_s25  ;;  %s197_s11 = scalar_lea.vmem %s658_s4, %s501_s25 }
  0x10   : > { %v198_v7 = vld [vmem:[%s192_s28] sm:$0xff]  ;;  %v199_v9 = vld [vmem:[%s192_s28 + $0x8] sm:$0xff]  ;;  %v200_v11 = vld [vmem:[%s192_s28 + $0x10] sm:$0xff] }
  0x11   : > { %v202_v8 = vld [vmem:[%s192_s28 + $0x20] sm:$0xff]  ;;  %526 = vmatprep.mubr.msk.f32.mxu0 %vm211_vm0, %v198_v7  ;;  %v203_v10 = vld [vmem:[%s192_s28 + $0x28] sm:$0xff]  ;;  %v204_v12 = vld [vmem:[%s192_s28 + $0x30] sm:$0xff]  ;;  %525 = vmatpush3.msk.msra.mxu0 %vm236_vm1, %v210_v6 }
  0x12   : > { %532 = vmatprep.mubr.msk.f32.mxu1 %vm211_vm0, %v202_v8  ;;  %551 = vmatpush3.msk.msra.mxu1 %vm236_vm1, %v210_v6  ;;  %v201_v13 = vld [vmem:[%s192_s28 + $0x18] sm:$0xff] }
  0x13   : > { %527 = vmatmul.mubr.msk.f32.vlgmr.msra.gmra.mrb[0].mxu0 %vm211_vm0, %v199_v9  ;;  %533 = vmatmul.mubr.msk.f32.vlgmr.msra.gmra.mrb[0].mxu1 %vm211_vm0, %v203_v10  ;;  %v205_v14 = vld [vmem:[%s192_s28 + $0x38] sm:$0xff] }
  0x14   : > { %529 = vmatprep.mubr.msk.f32.mxu0 %vm211_vm0, %v200_v11  ;;  %535 = vmatprep.mubr.msk.f32.mxu1 %vm211_vm0, %v204_v12 }
  0x17   : > { %530 = vmatmul.mubr.msk.f32.gmra.mrb[2].mxu0 %vm211_vm0, %v201_v13  ;;  %536 = vmatmul.mubr.msk.f32.gmra.mrb[2].mxu1 %vm211_vm0, %v205_v14 }
  0xe6   : > { %v528_v16 = vpop.f32.mrb[0].mxu0  ;;  %v534_v18 = vpop.f32.mrb[0].mxu1 }
  0xe7   : > { %v353_v19 = vmul.f32 %v528_v16, %v497_v15  ;;  %v357_v20 = vmul.f32 %v534_v18, %v497_v15  ;;  %v306_v21 = vpop.f32.mrb[1].mxu0  ;;  %v326_v22 = vpop.f32.mrb[1].mxu1 }
  0xe8   : > { %v352_v23 = vmul.f32 %v497_v15, %v306_v21  ;;  %v356_v24 = vmul.f32 %v497_v15, %v326_v22 }
  0xe9   : > { %v368_v25 = vadd.f32 %v498_v17, %v353_v19  ;;  %v372_v26 = vadd.f32 %v498_v17, %v357_v20 }
  0xea   : > { %v367_v27 = vadd.f32 %v498_v17, %v352_v23  ;;  %v371_v28 = vadd.f32 %v498_v17, %v356_v24  ;;  %v531_v29 = vpop.f32.mrb[2].mxu0  ;;  %v537_v30 = vpop.f32.mrb[2].mxu1 }
  0xeb   : > { %v376_v31 = vadd.f32 3.0, %v368_v25  ;;  %v380_v32 = vadd.f32 3.0, %v372_v26  ;;  %v355_v33 = vmul.f32 %v531_v29, %v497_v15  ;;  %v359_v34 = vmul.f32 %v537_v30, %v497_v15  ;;  %v316_v35 = vpop.f32.mrb[3].mxu0  ;;  %v336_v36 = vpop.f32.mrb[3].mxu1 }
  0xec   : > { %v375_v37 = vadd.f32 3.0, %v367_v27  ;;  %v379_v38 = vadd.f32 3.0, %v371_v28  ;;  %v354_v39 = vmul.f32 %v497_v15, %v316_v35  ;;  %v358_v40 = vmul.f32 %v497_v15, %v336_v36 }
  0xed   : > { %v384_v41 = vmax.f32 %v376_v31, 0.0  ;;  %v388_v42 = vmax.f32 %v380_v32, 0.0  ;;  %v370_v43 = vadd.f32 %v498_v17, %v355_v33  ;;  %v374_v44 = vadd.f32 %v498_v17, %v359_v34 }
  0xee   : > { %v383_v45 = vmax.f32 %v375_v37, 0.0  ;;  %v387_v46 = vmax.f32 %v379_v38, 0.0  ;;  %v369_v47 = vadd.f32 %v498_v17, %v354_v39  ;;  %v373_v48 = vadd.f32 %v498_v17, %v358_v40 }
  0xef   : > { %v392_v49 = vmin.f32 %v384_v41, 6.0  ;;  %v396_v50 = vmin.f32 %v388_v42, 6.0  ;;  %v378_v51 = vadd.f32 3.0, %v370_v43  ;;  %v382_v52 = vadd.f32 3.0, %v374_v44 }
  0xf0   : > { %v391_v53 = vmin.f32 %v383_v45, 6.0  ;;  %v395_v54 = vmin.f32 %v387_v46, 6.0  ;;  %v377_v55 = vadd.f32 3.0, %v369_v47  ;;  %v381_v56 = vadd.f32 3.0, %v373_v48 }
  0xf1   : > { %v400_v57 = vmul.f32 %v392_v49, %v368_v25  ;;  %v404_v58 = vmul.f32 %v396_v50, %v372_v26  ;;  %v386_v59 = vmax.f32 %v378_v51, 0.0  ;;  %v390_v60 = vmax.f32 %v382_v52, 0.0 }
  0xf2   : > { %v399_v61 = vmul.f32 %v391_v53, %v367_v27  ;;  %v403_v62 = vmul.f32 %v395_v54, %v371_v28  ;;  %v385_v63 = vmax.f32 %v377_v55, 0.0  ;;  %v389_v0 = vmax.f32 %v381_v56, 0.0 }
  0xf3   : > { %v408_v1 = vmul.f32 0.16666667, %v400_v57  ;;  %v412_v2 = vmul.f32 0.16666667, %v404_v58  ;;  %v394_v3 = vmin.f32 %v386_v59, 6.0  ;;  %v398_v4 = vmin.f32 %v390_v60, 6.0 }
  0xf4   : > { %v407_v5 = vmul.f32 0.16666667, %v399_v61  ;;  %v411_v6 = vmul.f32 0.16666667, %v403_v62  ;;  %v393_v7 = vmin.f32 %v385_v63, 6.0  ;;  %v397_v8 = vmin.f32 %v389_v0, 6.0 }
  0xf5   : > { %417 = vst.msk [vmem:[%s197_s11 + $0x8] sm:$0xff] %vm415_vm2, %v408_v1  ;;  %421 = vst.msk [vmem:[%s197_s11 + $0x28] sm:$0xff] %vm415_vm2, %v412_v2  ;;  %v402_v9 = vmul.f32 %v394_v3, %v370_v43  ;;  %v406_v10 = vmul.f32 %v398_v4, %v374_v44 }
  0xf6   : > { %416 = vst.msk [vmem:[%s197_s11] sm:$0xff] %vm415_vm2, %v407_v5  ;;  %420 = vst.msk [vmem:[%s197_s11 + $0x20] sm:$0xff] %vm415_vm2, %v411_v6  ;;  %v401_v11 = vmul.f32 %v393_v7, %v369_v47  ;;  %v405_v12 = vmul.f32 %v397_v8, %v373_v48 }
  0xf7   : > { %v410_v13 = vmul.f32 0.16666667, %v402_v9  ;;  %v414_v14 = vmul.f32 0.16666667, %v406_v10 }
  0xf8   : > { %v409_v15 = vmul.f32 0.16666667, %v401_v11  ;;  %v413_v16 = vmul.f32 0.16666667, %v405_v12 }
  0xf9   : > { %419 = vst.msk [vmem:[%s197_s11 + $0x18] sm:$0xff] %vm415_vm2, %v410_v13  ;;  %423 = vst.msk [vmem:[%s197_s11 + $0x38] sm:$0xff] %vm415_vm2, %v414_v14 }
  0xfa   : > { %418 = vst.msk [vmem:[%s197_s11 + $0x10] sm:$0xff] %vm415_vm2, %v409_v15  ;;  %422 = vst.msk [vmem:[%s197_s11 + $0x30] sm:$0xff] %vm415_vm2, %v413_v16 }
  0xfb PF: > { %s14_s15 = sadd.s32 1, %s566_s15  }
  0xfc   : > { %p11_p4 = scmp.ge.s32.totalorder %s14_s15, 4  }
  0xfe   :  { %13 = sbr.rel (!%p11_p4) target bundleno = 1 (0x1), region = 66 }

</bundles_post_ra>
